<compile_context>
chip_gen: v7x
topology: tpu7x:2x2x1
jax: 0.10.0
libtpu: 0.0.40
codegen_flags: <defaults>
</compile_context>

<pallas_src>
import jax
import jax.numpy as jnp
from jax.experimental import pallas as pl
from jax.experimental.pallas import tpu as pltpu

K_SORT = 30                   # SortAggregation k
KSIZE = 5                     # Conv1d kernel size
L_OUT = K_SORT - KSIZE + 1    # 26
CONV_OUT = 32                 # Conv1d out channels
CPAD = 128                    # channel padding (lane width)


def _round_up(x, m):
    return ((x + m - 1) // m) * m


def _pick_tm(npad):
    """Adjacency row-strip height.  Small graphs: 64 (exercises the tiled path).
    Large graphs: largest power of two <= 256 whose double-buffered bf16 strip
    stays ~<= 8 MiB (safe for v7x's 64 MiB VMEM as well as v5e/v6e)."""
    if npad <= 512:
        return min(64, npad)
    budget = 4 * 1024 * 1024          # bytes per strip (x2 for double buffering)
    tm = 256
    while tm > 8 and (npad % tm != 0 or tm * npad * 2 > budget):
        tm //= 2
    return tm


def _vmem_specs(n):
    return [pl.BlockSpec(memory_space=pltpu.MemorySpace.VMEM) for _ in range(n)]


# ---------------------------------------------------------------------------
# Fused SAGE stack: for each layer  h <- relu( (A @ h) @ Wl + h @ Wr + b )
# A is the row-normalized dense adjacency (scatter-mean as matmul), bf16.
# grid = (num_layers, num_row_blocks); the full running h is kept in a bf16
# ping-pong scratch so layers chain without HBM round trips.
# ---------------------------------------------------------------------------
def sage_stack_kernel(adj_ref, x0_ref, wl_ref, wr_ref, b_ref, o_ref, h_scr):
    l = pl.program_id(0)              # layer index (sequential)
    i = pl.program_id(1)              # row block index
    tm = o_ref.shape[0]
    npad = x0_ref.shape[0]

    # Seed the ping-pong scratch with the padded input features once.
    @pl.when((l == 0) & (i == 0))
    def _seed():
        h_scr[pl.ds(0, npad), :] = x0_ref[...]

    parity = l % 2
    in_base = pl.multiple_of(parity * npad, npad)          # layer input slot
    out_base = pl.multiple_of((1 - parity) * npad, npad)   # layer output slot
    row0 = pl.multiple_of(i * tm, tm)

    a_blk = adj_ref[...]                                       # [tm, npad]  bf16
    h_full = h_scr[pl.ds(in_base, npad), :]                    # [npad, 128] bf16
    h_rows = h_scr[pl.ds(pl.multiple_of(in_base + row0, tm), tm), :]   # [tm, 128]

    # bf16 x bf16 MXU matmul with f32 accumulation for the dominant A @ H term.
    aggr = jnp.dot(a_blk, h_full, preferred_element_type=jnp.float32)   # [tm, 128]

    out = (jnp.dot(aggr, wl_ref[0], preferred_element_type=jnp.float32)
           + jnp.dot(h_rows.astype(jnp.float32), wr_ref[0],
                     preferred_element_type=jnp.float32)
           + b_ref[0])
    out = jnp.maximum(out, 0.0)                                # f32 epilogue (v5e-safe)

    h_scr[pl.ds(pl.multiple_of(out_base + row0, tm), tm), :] = out.astype(jnp.bfloat16)
    o_ref[...] = out                                           # last layer's write wins


def sage_stack(adj_bf16, x0_pad, wl, wr, b, *, npad, tm):
    n_layers = wl.shape[0]
    grid = (n_layers, npad // tm)
    return pl.pallas_call(
        sage_stack_kernel,
        out_shape=jax.ShapeDtypeStruct((npad, CPAD), jnp.float32),
        grid_spec=pltpu.PrefetchScalarGridSpec(
            num_scalar_prefetch=0,
            grid=grid,
            in_specs=[
                pl.BlockSpec((tm, npad), lambda l, i: (i, 0)),          # adj row strip
                pl.BlockSpec((npad, CPAD), lambda l, i: (0, 0)),        # x0 (resident)
                pl.BlockSpec((1, CPAD, CPAD), lambda l, i: (l, 0, 0)),  # W_l (per layer)
                pl.BlockSpec((1, CPAD, CPAD), lambda l, i: (l, 0, 0)),  # W_r (per layer)
                pl.BlockSpec((1, 1, CPAD), lambda l, i: (l, 0, 0)),     # bias (per layer)
            ],
            out_specs=pl.BlockSpec((tm, CPAD), lambda l, i: (i, 0)),
            scratch_shapes=[pltpu.VMEM((2 * npad, CPAD), jnp.bfloat16)],  # ping-pong h
        ),
        # row-block axis carries a cross-block dependency through the scratch,
        # so both axes must stay "arbitrary" (no megacore sharding here).
        compiler_params=pltpu.CompilerParams(
            dimension_semantics=("arbitrary", "arbitrary")),
    )(adj_bf16, x0_pad, wl, wr, b)


# ---------------------------------------------------------------------------
# Fused tail: conv1d (as a single banded matmul, columns already in torch's
# NCL-flatten order) + ReLU + lin1 + ReLU + (dropout=identity in eval) + lin2
# + log_softmax, all in one pallas_call.
# ---------------------------------------------------------------------------
def tail_kernel(xf_ref, wc_ref, bc_ref, w1_ref, b1_ref, w2_ref, b2_ref, o_ref):
    conv = jnp.dot(xf_ref[...], wc_ref[...],
                   preferred_element_type=jnp.float32) + bc_ref[...]     # [B, 832]
    conv = jnp.maximum(conv, 0.0)
    h = jnp.dot(conv, w1_ref[...], preferred_element_type=jnp.float32) + b1_ref[...]
    h = jnp.maximum(h, 0.0)
    # dropout(p=0.5) is identity in eval mode (training=False)
    logits = jnp.dot(h, w2_ref[...], preferred_element_type=jnp.float32) + b2_ref[...]
    m = jnp.max(logits, axis=-1, keepdims=True)
    lse = jnp.log(jnp.sum(jnp.exp(logits - m), axis=-1, keepdims=True)) + m
    o_ref[...] = logits - lse


def tail(xf, wconv, bconv, w1, b1, w2, b2):
    b = xf.shape[0]
    nclass = w2.shape[1]
    return pl.pallas_call(
        tail_kernel,
        out_shape=jax.ShapeDtypeStruct((b, nclass), jnp.float32),
        in_specs=_vmem_specs(7),
        out_specs=pl.BlockSpec(memory_space=pltpu.MemorySpace.VMEM),
    )(xf, wconv, bconv, w1, b1, w2, b2)


# ---------------------------------------------------------------------------
# SortAggregation(k=30) — matches torch_geometric semantics: dense-batch with
# fill = x.min()-1, per-graph descending sort on the last feature channel,
# take top-k rows, replace fill with 0.  Buffer sized by max nodes-per-graph.
# Precondition: `batch` is sorted / contiguous per graph.
# TODO(synk): the data-dependent per-graph argsort stays in XLA glue (no clean
# Pallas sorting primitive); everything around it runs in Pallas kernels.
# ---------------------------------------------------------------------------
def sort_pool(x, batch, num_graphs, k):
    n, d = x.shape
    fill = jnp.min(x) - 1.0
    counts = jnp.bincount(batch, length=num_graphs)
    starts = jnp.concatenate(
        [jnp.zeros((1,), counts.dtype), jnp.cumsum(counts)[:-1]])
    pos = jnp.arange(n) - starts[batch]
    nmax = int(max(int(jnp.max(counts)), k))          # per-graph max, >= k
    dense = jnp.full((num_graphs, nmax, d), fill, dtype=x.dtype)
    dense = dense.at[batch, pos].set(x)
    order = jnp.argsort(-dense[:, :, -1], axis=-1)    # descending on last channel
    dense = jnp.take_along_axis(dense, order[:, :, None], axis=1)
    topk = dense[:, :k, :]
    topk = jnp.where(topk == fill, 0.0, topk)
    return topk                                       # [B, k, d]


# ---------------------------------------------------------------------------
# Full forward pass
# ---------------------------------------------------------------------------
def forward(params, x, edge_index, batch, num_graphs):
    n, f = x.shape
    nhid = params["nhid"]
    npad = _round_up(n, 128)
    tm = _pick_tm(npad)

    # Row-normalized scatter-mean adjacency, built densely in glue, stored bf16.
    # TODO(synk): replace the dense O(N^2) adjacency + A@H with a CSR/segment-sum
    # gather kernel (PrefetchScalarGridSpec row pointers) for graphs with E << N^2.
    src, dst = edge_index[0], edge_index[1]
    adj = jnp.zeros((npad, npad), jnp.float32).at[dst, src].add(1.0)
    deg = jnp.sum(adj, axis=1, keepdims=True)
    adj = (adj / jnp.maximum(deg, 1.0)).astype(jnp.bfloat16)

    # Pad node features to [npad, 128] bf16 (zero pad keeps padded rows/cols inert).
    x0 = jnp.zeros((npad, CPAD), jnp.bfloat16).at[:n, :f].set(x.astype(jnp.bfloat16))

    h_all = sage_stack(adj, x0, params["sage_wl"], params["sage_wr"],
                       params["sage_b"], npad=npad, tm=tm)       # [npad, 128] f32
    h = h_all[:n, :nhid]

    pooled = sort_pool(h, batch, num_graphs, K_SORT)             # [B, 30, nhid]
    pooled_flat = pooled.reshape(num_graphs, K_SORT * nhid)      # [B, 960]

    # Conv1d as a banded (Toeplitz) matmul.  Columns are laid out as o*L_OUT + t,
    # which is exactly torch's view(B, 32, 26).view(B, -1) order, so the permute
    # and flatten cost nothing and the kernel output is lane-dense (832 lanes).
    taps = jnp.stack([jnp.eye(K_SORT, L_OUT, k=-t, dtype=jnp.float32)
                      for t in range(KSIZE)])                    # [5, 30, 26]
    wconv = jnp.einsum("ast,aco->scot", taps, params["conv1d_w"])
    wconv = wconv.reshape(K_SORT * nhid, CONV_OUT * L_OUT)       # [960, 832]
    bconv = jnp.repeat(params["conv1d_b"], L_OUT)[None, :]       # [1, 832]

    return tail(pooled_flat, wconv, bconv,
                params["lin1_w"], params["lin1_b"],
                params["lin2_w"], params["lin2_b"])


if __name__ == "__main__":
    NUM_FEATURES, NHID, NUM_CLASSES, NUM_LAYERS = 16, 32, 8, 3
    B = 2
    NODES_PER_GRAPH = 32
    N = B * NODES_PER_GRAPH
    E = 256

    key = jax.random.PRNGKey(0)
    keys = jax.random.split(key, 8)

    x = jax.random.normal(keys[0], (N, NUM_FEATURES), jnp.float32)
    batch = jnp.repeat(jnp.arange(B, dtype=jnp.int32), NODES_PER_GRAPH)
    src_local = jax.random.randint(keys[1], (E,), 0, NODES_PER_GRAPH)
    dst_local = jax.random.randint(keys[2], (E,), 0, NODES_PER_GRAPH)
    g_of_edge = jax.random.randint(keys[3], (E,), 0, B)
    edge_index = jnp.stack([src_local + g_of_edge * NODES_PER_GRAPH,
                            dst_local + g_of_edge * NODES_PER_GRAPH])

    def init(k, shape, scale=0.1):
        return scale * jax.random.normal(k, shape, jnp.float32)

    pk = jax.random.split(keys[4], 16)

    # SAGE weights, zero-padded to [128, 128] and stacked along the layer axis.
    wl_list, wr_list, b_list = [], [], []
    fin = NUM_FEATURES
    for i in range(NUM_LAYERS):
        wl = init(pk[3 * i + 0], (fin, NHID))       # lin_l (aggregated) weight
        wr = init(pk[3 * i + 1], (fin, NHID))       # lin_r (root) weight
        bb = init(pk[3 * i + 2], (NHID,))
        wl_list.append(jnp.zeros((CPAD, CPAD), jnp.float32).at[:fin, :NHID].set(wl))
        wr_list.append(jnp.zeros((CPAD, CPAD), jnp.float32).at[:fin, :NHID].set(wr))
        b_list.append(jnp.zeros((1, CPAD), jnp.float32).at[:, :NHID].set(bb[None, :]))
        fin = NHID

    params = {
        "nhid": NHID,
        "sage_wl": jnp.stack(wl_list),                           # [L, 128, 128]
        "sage_wr": jnp.stack(wr_list),                           # [L, 128, 128]
        "sage_b": jnp.stack(b_list),                             # [L, 1, 128]
        "conv1d_w": init(pk[9], (KSIZE, NHID, CONV_OUT)),        # [tap, Cin, Cout]
        "conv1d_b": init(pk[10], (CONV_OUT,)),
        "lin1_w": init(pk[11], (CONV_OUT * L_OUT, NHID)),        # 832 -> nhid
        "lin1_b": init(pk[12], (1, NHID)),
        "lin2_w": init(pk[13], (NHID, NUM_CLASSES)),
        "lin2_b": init(pk[14], (1, NUM_CLASSES)),
    }

    out = forward(params, x, edge_index, batch, B)
    out = jax.block_until_ready(out)

    assert out.shape == (B, NUM_CLASSES)
    assert bool(jnp.all(jnp.isfinite(out)))
    # log_softmax rows must exponentiate-sum to 1
    assert bool(jnp.allclose(jnp.sum(jnp.exp(out), axis=-1), 1.0, atol=1e-3))
    print("KERNEL_OK")
</pallas_src>

<mosaic_0001>
module attributes {stable_mosaic.version = 11 : i64} {
  func.func @sage_stack_kernel(%arg0: i32, %arg1: i32, %arg2: memref<64x128xbf16, #tpu.memory_space<vmem>>, %arg3: memref<128x128xbf16, #tpu.memory_space<vmem>>, %arg4: memref<1x128x128xf32, #tpu.memory_space<vmem>>, %arg5: memref<1x128x128xf32, #tpu.memory_space<vmem>>, %arg6: memref<1x1x128xf32, #tpu.memory_space<vmem>>, %arg7: memref<64x128xf32, #tpu.memory_space<vmem>>, %arg8: memref<256x128xbf16, #tpu.memory_space<vmem>>) attributes {dimension_semantics = [#tpu.dimension_semantics<arbitrary>, #tpu.dimension_semantics<arbitrary>], iteration_bounds = array<i64: 3, 2>, scalar_prefetch = 0 : i64, scratch_operands = 1 : i64, tpu.core_type = #tpu.core_type<tc>, window_params = [{transform_indices = @transform_0, window_bounds = array<i64: 64, 128>}, {pipeline_mode = #tpu.pipeline_mode<synchronous>, transform_indices = @transform_1, window_bounds = array<i64: 128, 128>}, {transform_indices = @transform_2, window_bounds = array<i64: 1, 128, 128>}, {transform_indices = @transform_3, window_bounds = array<i64: 1, 128, 128>}, {transform_indices = @transform_4, window_bounds = array<i64: 1, 1, 128>}, {transform_indices = @transform_5, window_bounds = array<i64: 64, 128>}]} {
    %c0_i32 = arith.constant 0 : i32
    %0 = arith.cmpi eq, %arg0, %c0_i32 : i32
    %c0_i32_0 = arith.constant 0 : i32
    %1 = arith.cmpi eq, %arg1, %c0_i32_0 : i32
    %2 = arith.andi %0, %1 : i1
    %3 = arith.extui %2 : i1 to i32
    %c0_i32_1 = arith.constant 0 : i32
    %4 = arith.cmpi ne, %3, %c0_i32_1 : i32
    scf.if %4 {
      %c0_26 = arith.constant 0 : index
      %c0_27 = arith.constant 0 : index
      %50 = vector.load %arg3[%c0_26, %c0_27] : memref<128x128xbf16, #tpu.memory_space<vmem>>, vector<128x128xbf16>
      %c0_28 = arith.constant 0 : index
      %c0_29 = arith.constant 0 : index
      %51 = vector.load %arg8[%c0_28, %c0_29] : memref<256x128xbf16, #tpu.memory_space<vmem>>, vector<128x128xbf16>
      tpu.vector_store %arg8[%c0_28, %c0_29], %50 {strides = array<i32>} : memref<256x128xbf16, #tpu.memory_space<vmem>>, vector<128x128xbf16>,
    } else {
    }
    %c2_i32 = arith.constant 2 : i32
    %c0_i32_2 = arith.constant 0 : i32
    %5 = arith.cmpi eq, %c2_i32, %c0_i32_2 : i32
    %c1_i32 = arith.constant 1 : i32
    %6 = arith.select %5, %c1_i32, %c2_i32 : i32
    %7 = arith.remsi %arg0, %6 : i32
    %c0_i32_3 = arith.constant 0 : i32
    %8 = arith.cmpi ne, %7, %c0_i32_3 : i32
    %c0_i32_4 = arith.constant 0 : i32
    %9 = arith.cmpi slt, %7, %c0_i32_4 : i32
    %c0_i32_5 = arith.constant 0 : i32
    %10 = arith.cmpi slt, %6, %c0_i32_5 : i32
    %11 = arith.xori %9, %10 : i1
    %12 = arith.andi %11, %8 : i1
    %13 = arith.addi %7, %6 : i32
    %14 = arith.select %12, %13, %7 : i32
    %c128_i32 = arith.constant 128 : i32
    %15 = arith.muli %14, %c128_i32 : i32
    %16 = tpu.assume_multiple %15, 128 : i32
    %c1_i32_6 = arith.constant 1 : i32
    %17 = arith.subi %c1_i32_6, %14 : i32
    %c128_i32_7 = arith.constant 128 : i32
    %18 = arith.muli %17, %c128_i32_7 : i32
    %19 = tpu.assume_multiple %18, 128 : i32
    %c64_i32 = arith.constant 64 : i32
    %20 = arith.muli %arg1, %c64_i32 : i32
    %21 = tpu.assume_multiple %20, 64 : i32
    %c0 = arith.constant 0 : index
    %c0_8 = arith.constant 0 : index
    %22 = vector.load %arg2[%c0, %c0_8] : memref<64x128xbf16, #tpu.memory_space<vmem>>, vector<64x128xbf16>
    %23 = arith.index_cast %16 : i32 to index
    %c0_9 = arith.constant 0 : index
    %24 = vector.load %arg8[%23, %c0_9] : memref<256x128xbf16, #tpu.memory_space<vmem>>, vector<128x128xbf16>
    %25 = arith.addi %16, %21 : i32
    %26 = tpu.assume_multiple %25, 64 : i32
    %27 = arith.index_cast %26 : i32 to index
    %c0_10 = arith.constant 0 : index
    %28 = vector.load %arg8[%27, %c0_10] : memref<256x128xbf16, #tpu.memory_space<vmem>>, vector<64x128xbf16>
    %cst = arith.constant dense<0.000000e+00> : vector<64x128xf32>
    %29 = tpu.matmul %22, %24, %cst {dimension_numbers = #tpu.dot_dimension_numbers<[1], [0], [0], [1], [0, 0, 1, 1], [], []>} : vector<64x128xbf16>, vector<128x128xbf16>, vector<64x128xf32> -> vector<64x128xf32>
    %c0_11 = arith.constant 0 : index
    %c0_12 = arith.constant 0 : index
    %c0_13 = arith.constant 0 : index
    %30 = vector.load %arg4[%c0_11, %c0_12, %c0_13] : memref<1x128x128xf32, #tpu.memory_space<vmem>>, vector<1x128x128xf32>
    %31 = vector.shape_cast %30 : vector<1x128x128xf32> to vector<128x128xf32>
    %cst_14 = arith.constant dense<0.000000e+00> : vector<64x128xf32>
    %32 = tpu.matmul %29, %31, %cst_14 {dimension_numbers = #tpu.dot_dimension_numbers<[1], [0], [0], [1], [0, 0, 1, 1], [], []>} : vector<64x128xf32>, vector<128x128xf32>, vector<64x128xf32> -> vector<64x128xf32>
    %33 = arith.extf %28 : vector<64x128xbf16> to vector<64x128xf32>
    %c0_15 = arith.constant 0 : index
    %c0_16 = arith.constant 0 : index
    %c0_17 = arith.constant 0 : index
    %34 = vector.load %arg5[%c0_15, %c0_16, %c0_17] : memref<1x128x128xf32, #tpu.memory_space<vmem>>, vector<1x128x128xf32>
    %35 = vector.shape_cast %34 : vector<1x128x128xf32> to vector<128x128xf32>
    %cst_18 = arith.constant dense<0.000000e+00> : vector<64x128xf32>
    %36 = tpu.matmul %33, %35, %cst_18 {dimension_numbers = #tpu.dot_dimension_numbers<[1], [0], [0], [1], [0, 0, 1, 1], [], []>} : vector<64x128xf32>, vector<128x128xf32>, vector<64x128xf32> -> vector<64x128xf32>
    %37 = arith.addf %32, %36 : vector<64x128xf32>
    %c0_19 = arith.constant 0 : index
    %c0_20 = arith.constant 0 : index
    %c0_21 = arith.constant 0 : index
    %38 = vector.load %arg6[%c0_19, %c0_20, %c0_21] : memref<1x1x128xf32, #tpu.memory_space<vmem>>, vector<1x1x128xf32>
    %39 = vector.shape_cast %38 : vector<1x1x128xf32> to vector<1x128xf32>
    %40 = vector.broadcast %39 : vector<1x128xf32> to vector<64x128xf32>
    %41 = arith.addf %37, %40 : vector<64x128xf32>
    %cst_22 = arith.constant 0.000000e+00 : f32
    %42 = vector.broadcast %cst_22 : f32 to vector<64x128xf32>
    %43 = arith.maximumf %41, %42 : vector<64x128xf32>
    %44 = arith.truncf %43 : vector<64x128xf32> to vector<64x128xbf16>
    %45 = arith.addi %19, %21 : i32
    %46 = tpu.assume_multiple %45, 64 : i32
    %47 = arith.index_cast %46 : i32 to index
    %c0_23 = arith.constant 0 : index
    %48 = vector.load %arg8[%47, %c0_23] : memref<256x128xbf16, #tpu.memory_space<vmem>>, vector<64x128xbf16>
    tpu.vector_store %arg8[%47, %c0_23], %44 {strides = array<i32>} : memref<256x128xbf16, #tpu.memory_space<vmem>>, vector<64x128xbf16>,
    %c0_24 = arith.constant 0 : index
    %c0_25 = arith.constant 0 : index
    %49 = vector.load %arg7[%c0_24, %c0_25] : memref<64x128xf32, #tpu.memory_space<vmem>>, vector<64x128xf32>
    tpu.vector_store %arg7[%c0_24, %c0_25], %43 {strides = array<i32>} : memref<64x128xf32, #tpu.memory_space<vmem>>, vector<64x128xf32>,
    return
  }
  func.func @transform_0(%arg0: i32, %arg1: i32) -> (i32, i32) {
    %c0_i32 = arith.constant 0 : i32
    %c0_i32_0 = arith.constant 0 : i32
    return %arg1, %c0_i32 : i32, i32
  }
  func.func @transform_1(%arg0: i32, %arg1: i32) -> (i32, i32) {
    %c0_i32 = arith.constant 0 : i32
    %c0_i32_0 = arith.constant 0 : i32
    %c0_i32_1 = arith.constant 0 : i32
    return %c0_i32, %c0_i32_0 : i32, i32
  }
  func.func @transform_2(%arg0: i32, %arg1: i32) -> (i32, i32, i32) {
    %c0_i32 = arith.constant 0 : i32
    %c0_i32_0 = arith.constant 0 : i32
    %c0_i32_1 = arith.constant 0 : i32
    return %arg0, %c0_i32, %c0_i32_0 : i32, i32, i32
  }
  func.func @transform_3(%arg0: i32, %arg1: i32) -> (i32, i32, i32) {
    %c0_i32 = arith.constant 0 : i32
    %c0_i32_0 = arith.constant 0 : i32
    %c0_i32_1 = arith.constant 0 : i32
    return %arg0, %c0_i32, %c0_i32_0 : i32, i32, i32
  }
  func.func @transform_4(%arg0: i32, %arg1: i32) -> (i32, i32, i32) {
    %c0_i32 = arith.constant 0 : i32
    %c0_i32_0 = arith.constant 0 : i32
    %c0_i32_1 = arith.constant 0 : i32
    return %arg0, %c0_i32, %c0_i32_0 : i32, i32, i32
  }
  func.func @transform_5(%arg0: i32, %arg1: i32) -> (i32, i32) {
    %c0_i32 = arith.constant 0 : i32
    %c0_i32_0 = arith.constant 0 : i32
    return %arg1, %c0_i32 : i32, i32
  }
}

</mosaic_0001>

<bundles_post_ra>
// kernel: tpu_custom_call.1
= control target key start
LH: loop header
LB: loop body
LE: loop exit
PB: predicated region body
PF: predicated region fallthrough
CT: control target
= control target key end

     0   :  { %s2267_s0 = inlined_call_operand.hbm [shape: bf16[128,128], index: 0, kind: input, shape index: {}]   ;;  %s2268_s1 = inlined_call_operand.hbm [shape: bf16[128,128], index: 1, kind: input, shape index: {}]   ;;  %s2269_s2 = inlined_call_operand.hbm [shape: f32[3,128,128], index: 2, kind: input, shape index: {}]   ;;  %s2270_s3 = inlined_call_operand.hbm [shape: f32[3,128,128], index: 3, kind: input, shape index: {}]   ;;  %s2271_s4 = inlined_call_operand.vmem [shape: f32[3,1,128], index: 4, kind: input, shape index: {}]   ;;  %s2272_s5 = inlined_call_operand.hbm [shape: f32[128,128], index: 5, kind: output, shape index: {}]  }
   0x1   :  { %2293 = sst [smem:[#allocation21_spill]] %s2267_s0 }
   0x2   :  { %2294 = sst [smem:[#allocation22_spill]] %s2269_s2 }
   0x3   :  { %2295 = sst [smem:[#allocation23_spill]] %s2270_s3 }
   0x4   :  { %2296 = sst [smem:[#allocation24_spill]] %s2272_s5 }
   0x5   :  { %10 = vsyncpa [#allocation4], 0 }
   0x6   :  { %12 = vsyncpa [#allocation4 + $0x1], 0 }
   0x7   :  { %13 = vsyncpa [#allocation7], 0 }
   0x8   :  { %14 = vsyncpa [#allocation5], 0 }
   0x9   :  { %16 = vsyncpa [#allocation5 + $0x1], 0  ;;  %s1773_s18 = smov 0   ;;  %s1775_s19 = smov 0  }
   0xa   :  { %s1777_s20 = smov 0   ;;  %s1779_s21 = smov 0  }
   0xb   :  { %s1781_s22 = smov 0   ;;  %s1783_s23 = smov 0  }
   0xc   :  { %s1785_s24 = smov 0   ;;  %s1787_s25 = smov 0  }
   0xd   :  { %s1789_s26 = smov 0   ;;  %s1791_s27 = smov 0  }
   0xe   :  { %s1793_s28 = smov 0  }
   0xf LB: > { %2297 = sst [smem:[#allocation15_spill]] %s1710_s23  ;;  %s31_s29 = sadd.s32 1, %s1722_s26  ;;  %s1730_s28 = sphi %s1793_s28, %s22_s28   ;;  %s1726_s27 = sphi %s1791_s27, %s2338_s27   ;;  %s1722_s26 = sphi %s1789_s26, %s2337_s26   ;;  %s1718_s25 = sphi %s1787_s25, %s2336_s25   ;;  %s1714_s24 = sphi %s1785_s24, %s2335_s24   ;;  %s1710_s23 = sphi %s1783_s23, %s2334_s23   ;;  %s1706_s22 = sphi %s1781_s22, %s2343_s22   ;;  %s1702_s21 = sphi %s1779_s21, %s2342_s21   ;;  %s1698_s20 = sphi %s1777_s20, %s2341_s20   ;;  %s1694_s19 = sphi %s1775_s19, %s2340_s19   ;;  %s1690_s18 = sphi %s1773_s18, %s2339_s18  }
  0x10   : > { %2298 = sst [smem:[#allocation16_spill]] %s1722_s26  ;;  %s41_s30 = sadd.s32 1, %s1710_s23 }
  0x11   : > { %2299 = sst [smem:[#allocation17_spill]] %s1726_s27  ;;  %p1830_p0 = scmp.ge.s32.totalorder %s31_s29, 2 }
  0x12   : > { %p2274_p1 = scmp.ne.s32.totalorder %s1710_s23, %s1706_s22  ;;  %p2276_p2 = scmp.eq.s32.totalorder %s1730_s28, 0 }
  0x13   : > { %s2345_s29 = smov (%p1830_p0, %s31_s29), 0  ;;  %p2275_p5 = scmp.lt.s32.totalorder %s1730_s28, 6 }
  0x14   : > { %2301 = sst [smem:[#allocation18_spill]] %s2345_s29  ;;  %p1846_p3 = por %p2276_p2, %p2274_p1 }
  0x15   : > { %s38_s8 = ssub.s32 %s1722_s26, %s2345_s29  ;;  %s216_s9 = sand.u32 1, %s1730_s28  }
  0x16   : > { %p39_p4 = scmp.eq.s32.totalorder %s38_s8, 0  ;;  %s218_s10 = sand.u32 1, %s1710_s23  }
  0x17   : > { %s1035_s12 = sshll.u32 %s218_s10, 5  ;;  %s1077_s13 = sshll.u32 %s1722_s26, 9 }
  0x18   : > { %s1856_s11 = scalar_select %p39_p4, %s1710_s23, %s41_s30  }
  0x19   : > { %s2304_s0 = sld [smem:[#allocation21_spill]]  ;;  %s220_s17 = scalar_lea.vmem [#allocation3], %s1035_s12 }
  0x1a   : > { %2303 = sst [smem:[#allocation19_spill]] %s1856_s11  ;;  %s227_s5 = sshll.u32 %s220_s17, 4  ;;  %s1864_s5 = int_to_ptr.vmem [resolvable:$true] %s227_s5 }
  0x1b   : > { %p1870_p6 = pnand %p2275_p5, %p1846_p3  ;;  %s1874_s8 = scalar_lea.sflag [#allocation4], %s216_s9 }
  0x1d   : > { %p1484_p8 = pneg %p1870_p6 }
  0x1f   : > { %s1862_s16 = scalar_lea.hbm %s2304_s0, %s1077_s13  ;;  %s1487_s7 = scalar_lea.hbm %s2304_s0, 1024 }
  0x20   : > { %s1482_s10 = scalar_lea.hbm %s1862_s16, 512  ;;  %p1488_p11 = scmp.lt.u32.totalorder %s1862_s16, %s2304_s0 }
  0x21   : > { %p1483_p7 = scmp.ne.s32.totalorder %s1862_s16, %s1482_s10  ;;  %p1489_p12 = scmp.lt.u32.totalorder %s1487_s7, %s1482_s10 }
  0x22   : > { %p1491_p3 = scmp.lt.u32.totalorder %s1482_s10, %s1862_s16 }
  0x23   : > { %p1485_p9 = pnand %p1484_p8, %p1483_p7  ;;  %p1490_p13 = por %p1489_p12, %p1488_p11 }
  0x25   : > { %p1486_p10 = pneg %p1485_p9  ;;  %p1492_p4 = por %p1491_p3, %p1490_p13 }
  0x27   : > { %p1493_p1 = pnand %p1492_p4, %p1486_p10 }
  0x29   : > { %1496 = shalt.err (!%p1493_p1)
}
  0x2a   : > { %s1497_s9 = scalar_lea.vmem %s1864_s5, 512  ;;  %s1732_s17 = smov [#allocation3]  }
  0x2b   : > { %p1498_p7 = scmp.ne.s32.totalorder %s1864_s5, %s1497_s9  ;;  %s1502_s12 = sshll.u32 %s1732_s17, 4  ;;  %s1503_s12 = int_to_ptr.vmem [resolvable:$false] %s1502_s12 }
  0x2c   : > { %s1504_s13 = scalar_lea.vmem %s1503_s12, 1024  ;;  %p1505_p2 = scmp.lt.s32.totalorder %s1864_s5, %s1503_s12 }
  0x2d   : > { %p1500_p9 = pnand %p1498_p7, %p1484_p8  ;;  %p1506_p11 = scmp.lt.s32.totalorder %s1504_s13, %s1497_s9 }
  0x2f   : > { %p1501_p5 = pneg %p1500_p9  ;;  %p1507_p12 = por %p1506_p11, %p1505_p2 }
  0x31   : > { %p1508_p13 = pnand %p1507_p12, %p1501_p5 }
  0x33   : > { %1511 = shalt.err (!%p1508_p13)
}
  0x34   : > { %s2277_s10 = smov 64   ;;  %s2278_s7 = smov 4  }
  0x35   : > { %1360 = dma.hbm_to_vmem [thread:$0]  (!%p1870_p6), %s1862_s16, 512, %s1864_s5, %s1874_s8, %s2277_s10, %s2277_s10, %s2278_s7  }
  0x36   : > { %s34_s14 = sadd.s32 1, %s1726_s27  ;;  %s88_s15 = sadd.s32 1, %s1698_s20 }
  0x37   : > { %s2347_s14 = smov (!%p1830_p0, %s34_s14), %s1726_s27  ;;  %p95_p1 = scmp.ne.s32.totalorder %s1698_s20, %s1694_s19 }
  0x38   : > { %p36_p2 = scmp.ge.s32.totalorder %s2347_s14, 3  ;;  %s239_s9 = sand.u32 1, %s1698_s20  }
  0x39   : > { %p2306_p5 = scmp.eq.s32.totalorder %s1730_s28, 0  ;;  %s1915_s17 = sshll.u32 %s239_s9, 7 }
  0x3a   : > { %s2349_s14 = smov (%p36_p2, %s2347_s14), 0  ;;  %s2279_s30 = sshll.u32 %s1726_s27, 11 }
  0x3b   : > { %p97_p8 = por %p95_p1, %p2306_p5  ;;  %2307 = sst [smem:[#allocation20_spill]] %s2349_s14 }
  0x3c   : > { %s85_s12 = ssub.s32 %s1726_s27, %s2349_s14  ;;  %s2308_s2 = sld [smem:[#allocation22_spill]] }
  0x3d   : > { %p86_p0 = scmp.eq.s32.totalorder %s85_s12, 0  ;;  %s241_s13 = scalar_lea.vmem [#allocation8], %s1915_s17 }
  0x3e   : > { %s248_s9 = sshll.u32 %s241_s13, 4  ;;  %p2309_p6 = scmp.lt.s32.totalorder %s1730_s28, 6  ;;  %s1930_s9 = int_to_ptr.vmem [resolvable:$true] %s248_s9 }
  0x3f   : > { %s1939_s7 = scalar_select %p86_p0, %s1698_s20, %s88_s15  }
  0x40   : > { %p1934_p10 = pnand %p2309_p6, %p97_p8 }
  0x42   : > { %s1927_s16 = scalar_lea.hbm %s2308_s2, %s2279_s30  ;;  %p2280_p4 = pneg %p1934_p10 }
  0x43   : > { %s1512_s5 = scalar_lea.hbm %s1927_s16, 2048  ;;  %s1517_s13 = scalar_lea.hbm %s2308_s2, 6144 }
  0x44   : > { %p1513_p3 = scmp.ne.s32.totalorder %s1927_s16, %s1512_s5  ;;  %p1518_p11 = scmp.lt.u32.totalorder %s1927_s16, %s2308_s2 }
  0x45   : > { %p1519_p12 = scmp.lt.u32.totalorder %s1517_s13, %s1512_s5  ;;  %p1521_p1 = scmp.lt.u32.totalorder %s1512_s5, %s1927_s16 }
  0x46   : > { %p1515_p7 = pnand %p2280_p4, %p1513_p3 }
  0x47   : > { %p1520_p13 = por %p1519_p12, %p1518_p11 }
  0x48   : > { %p1516_p9 = pneg %p1515_p7 }
  0x49   : > { %p1522_p2 = por %p1521_p1, %p1520_p13 }
  0x4b   : > { %p1523_p5 = pnand %p1522_p2, %p1516_p9 }
  0x4d   : > { %1526 = shalt.err (!%p1523_p5)
}
  0x4e   : > { %s1527_s15 = scalar_lea.vmem %s1930_s9, 2048  ;;  %s1735_s12 = smov [#allocation8]  }
  0x4f   : > { %p1528_p8 = scmp.ne.s32.totalorder %s1930_s9, %s1527_s15  ;;  %s1532_s6 = sshll.u32 %s1735_s12, 4  ;;  %s1533_s6 = int_to_ptr.vmem [resolvable:$false] %s1532_s6 }
  0x50   : > { %s1534_s0 = scalar_lea.vmem %s1533_s6, 4096  ;;  %p1535_p3 = scmp.lt.s32.totalorder %s1930_s9, %s1533_s6 }
  0x51   : > { %p1530_p0 = pnand %p1528_p8, %p2280_p4  ;;  %p1536_p7 = scmp.lt.s32.totalorder %s1534_s0, %s1527_s15 }
  0x53   : > { %p1531_p6 = pneg %p1530_p0  ;;  %p1537_p11 = por %p1536_p7, %p1535_p3 }
  0x55   : > { %p1538_p12 = pnand %p1537_p11, %p1531_p6 }
  0x57   : > { %1541 = shalt.err (!%p1538_p12)
}
  0x58   : > { %s2281_s30 = smov 128   ;;  %s2282_s5 = smov 8  }
  0x59   : > { %1363 = dma.hbm_to_vmem [thread:$0]  (!%p1934_p10), %s1927_s16, 2048, %s1930_s9, %s1874_s8, %s2281_s30, %s2281_s30, %s2282_s5  }
  0x5a   : > { %s1971_s13 = sadd.s32 4294967295, %s1730_s28   ;;  %s1031_s15 = sadd.s32 4294967294, %s1730_s28  }
  0x5b   : > { %p54_p9 = scmp.ne.s32.totalorder %s1706_s22, %s1702_s21  ;;  %p2287_p13 = scmp.eq.s32.totalorder %s1971_s13, 0 }
  0x5c   : > { %p101_p1 = scmp.ne.s32.totalorder %s1694_s19, %s1690_s18  ;;  %p177_p2 = scmp.eq.s32.totalorder %s1971_s13, 5 }
  0x5d   : > { %p183_p5 = scmp.eq.s32.totalorder %s1031_s15, 5  ;;  %p1982_p8 = por %p2287_p13, %p54_p9 }
  0x5e   : > { %p1988_p0 = por %p101_p1, %p2287_p13  ;;  %p2313_p6 = scmp.ne.s32.totalorder %s1710_s23, %s1706_s22 }
  0x5f   : > { %s2311_s12 = scalar_select %p1982_p8, 1, 0 }
  0x60   : > { %s2312_s16 = scalar_select %p1988_p0, 1, 0 }
  0x61   : > { %p1995_p3 = por %p177_p2, %p2313_p6  ;;  %p1999_p7 = por %p183_p5, %p54_p9 }
  0x62   : > { %p1032_p11 = scmp.ge.s32.totalorder %s1730_s28, 1  ;;  %p190_p12 = scmp.lt.s32.totalorder %s1730_s28, 7 }
  0x63   : > { %s2314_s9 = scalar_select %p1995_p3, 1, 0 }
  0x64   : > { %s2315_s18 = scalar_select %p1999_p7, 1, 0 }
  0x65   : > { %p2005_p4 = pnand %p1032_p11, %p190_p12  ;;  %s1738_s0 = smov [#allocation6]  }
  0x66   : > { %s202_s15 = sshll.u32 %s1738_s0, 4  ;;  %s2317_s30 = sshll.u32 %s1726_s27, 11  ;;  %s2018_s15 = int_to_ptr.vmem [resolvable:$true] %s202_s15 }
  0x67   : > { %s2316_s6 = scalar_select %p2005_p4, 1, 0 }
  0x68   : > { %p1353_p1 = pneg %p2005_p4  ;;  %s2318_s3 = sld [smem:[#allocation23_spill]] }
  0x69   : > { %s262_s29 = scalar_lea.vmem [#allocation9], %s1915_s17  ;;  %p2320_p5 = pneg %p1934_p10 }
  0x6a   : > { %s269_s26 = sshll.u32 %s262_s29, 4  ;;  %p2023_p9 = pnand %p1353_p1, %p2287_p13  ;;  %s2027_s26 = int_to_ptr.vmem [resolvable:$true] %s269_s26 }
  0x6e   : > { %s2016_s14 = scalar_lea.hbm %s2318_s3, %s2317_s30  ;;  %s1547_s5 = scalar_lea.hbm %s2318_s3, 6144 }
  0x6f   : > { %s1542_s0 = scalar_lea.hbm %s2016_s14, 2048  ;;  %p1548_p12 = scmp.lt.u32.totalorder %s2016_s14, %s2318_s3 }
  0x70   : > { %p1543_p2 = scmp.ne.s32.totalorder %s2016_s14, %s1542_s0  ;;  %p1549_p1 = scmp.lt.u32.totalorder %s1547_s5, %s1542_s0 }
  0x71   : > { %p1551_p7 = scmp.lt.u32.totalorder %s1542_s0, %s2016_s14 }
  0x72   : > { %p1545_p6 = pnand %p1543_p2, %p2320_p5  ;;  %p1550_p13 = por %p1549_p1, %p1548_p12 }
  0x74   : > { %p1546_p11 = pneg %p1545_p6  ;;  %p1552_p3 = por %p1551_p7, %p1550_p13 }
  0x76   : > { %p1553_p0 = pnand %p1552_p3, %p1546_p11 }
  0x78   : > { %1556 = shalt.err (!%p1553_p0)
}
  0x79   : > { %s1557_s29 = scalar_lea.vmem %s2027_s26, 2048  ;;  %s1739_s2 = smov [#allocation9]  }
  0x7a   : > { %p1558_p2 = scmp.ne.s32.totalorder %s2027_s26, %s1557_s29  ;;  %s1562_s30 = sshll.u32 %s1739_s2, 4  ;;  %s1563_s30 = int_to_ptr.vmem [resolvable:$false] %s1562_s30 }
  0x7b   : > { %s1564_s27 = scalar_lea.vmem %s1563_s30, 4096  ;;  %p1565_p4 = scmp.lt.s32.totalorder %s2027_s26, %s1563_s30 }
  0x7c   : > { %p1560_p6 = pnand %p1558_p2, %p2320_p5  ;;  %p1566_p12 = scmp.lt.s32.totalorder %s1564_s27, %s1557_s29 }
  0x7e   : > { %p1561_p8 = pneg %p1560_p6  ;;  %p1567_p1 = por %p1566_p12, %p1565_p4 }
  0x80   : > { %p1568_p13 = pnand %p1567_p1, %p1561_p8 }
  0x82   : > { %1571 = shalt.err (!%p1568_p13)
}
  0x83   : > { %s2321_s0 = smov 8   ;;  %s2322_s5 = smov 128  }
  0x84   : > { %1366 = dma.hbm_to_vmem [thread:$0]  (!%p1934_p10), %s2016_s14, 2048, %s2027_s26, %s1874_s8, %s2322_s5, %s2322_s5, %s2321_s0  }
  0x85   : > { %s1572_s2 = scalar_lea.hbm %s2268_s1, 1024  ;;  %p1574_p8 = pneg %p2023_p9 }
  0x86   : > { %p1573_p4 = scmp.ne.s32.totalorder %s2268_s1, %s1572_s2  ;;  %p1579_p7 = scmp.lt.u32.totalorder %s1572_s2, %s2268_s1 }
  0x88   : > { %p1575_p0 = pnand %p1574_p8, %p1573_p4 }
  0x8a   : > { %p1576_p3 = pneg %p1575_p0 }
  0x8c   : > { %p1581_p11 = pnand %p1579_p7, %p1576_p3 }
  0x8e   : > { %1584 = shalt.err (!%p1581_p11)
}
  0x8f   : > { %s1585_s26 = scalar_lea.vmem %s2018_s15, 1024  ;;  %p1593_p6 = scmp.lt.s32.totalorder %s2018_s15, %s2018_s15 }
  0x90   : > { %p1586_p10 = scmp.ne.s32.totalorder %s2018_s15, %s1585_s26  ;;  %p1594_p12 = scmp.lt.s32.totalorder %s1585_s26, %s1585_s26 }
  0x92   : > { %p1588_p2 = pnand %p1586_p10, %p1574_p8  ;;  %p1595_p1 = por %p1594_p12, %p1593_p6 }
  0x94   : > { %p1589_p5 = pneg %p1588_p2 }
  0x96   : > { %p1596_p13 = pnand %p1595_p1, %p1589_p5 }
  0x98   : > { %1599 = shalt.err (!%p1596_p13)
}
  0x99   : > { %s2323_s3 = smov 4   ;;  %s2324_s23 = smov 64  }
  0x9a   : > { %1356 = dma.hbm_to_vmem [thread:$0]  (!%p2023_p9), %s2268_s1, 1024, %s2018_s15, [#allocation7], %s2324_s23, %s2324_s23, %s2323_s3  }
  0x9b   : > { %p2325_p4 = scmp.ne.s32.totalorder %s2316_s6, 0 }
  0x9c   : > { %s289_s27 = sand.u32 (!%p2325_p4), 1, %s1971_s13   ;;  %s2084_s0 = sand.u32 (!%p2325_p4), 1, %s1706_s22  }
  0x9d   : > { %287 = sbr.rel (%p2325_p4) target bundleno = 688 (0x2b0), region = 40  ;;  %s1045_s5 = sshll.u32 (!%p2325_p4), %s2084_s0, 5 }
  0x9e   : > { %s290_s11 = scalar_lea.sflag (!%p2325_p4), [#allocation4], %s289_s27  ;;  %s2087_s17 = scalar_lea.vmem (!%p2325_p4), [#allocation3], %s1045_s5 }
  0x9f   : > { %p2326_p8 = scmp.ne.s32.totalorder (!%p2325_p4), %s2311_s12, 0 }
  0xa4   : > { %1673 = dma.done.wait (%p2326_p8), %s290_s11, 512  }
  0xa5   : > { %1675 = vsyncadd (%p2326_p8), %s290_s11, 4294966784  ;;  %p2327_p9 = scmp.eq.s32.totalorder %s1971_s13, 0 }
  0xa7   : > { %1677 = dma.done.wait (%p2327_p9), [#allocation7], 1024   ;;  %p2328_p0 = pmov %p2327_p9 }
  0xa8   : > { %s304_s6 = sand.u32 1, %s1694_s19   ;;  %p2329_p3 = scmp.ne.s32.totalorder %s2312_s16, 0 }
  0xa9   : > { %1679 = vsyncadd (%p2328_p0), [#allocation7], 4294966272  ;;  %s1047_s15 = sshll.u32 %s304_s6, 7 }
  0xaa   : > { %s2098_s2 = scalar_lea.vmem [#allocation8], %s1047_s15 }
  0xab   : > { %1681 = dma.done.wait (%p2329_p3), %s290_s11, 4096  }
  0xac   : > { %1683 = vsyncadd (%p2329_p3), %s290_s11, 4294963200  ;;  %s1049_s12 = sshll.u32 %s2084_s0, 6  ;;  %p356_p7 = scmp.lt.s32.totalorder %s1718_s25, 2 }
  0xad   : > { %p361_p11 = scmp.eq.s32.totalorder %s1718_s25, 0  ;;  %p362_p10 = scmp.eq.s32.totalorder %s1714_s24, 0 }
  0xae   : > { %s2109_s13 = scalar_select %p356_p7, %s1718_s25, 2 }
  0xaf   : > { %p363_p2 = pnand %p362_p10, %p361_p11  ;;  %s2115_s26 = scalar_lea.vmem [#allocation9], %s1047_s15 }
  0xb0   : > { %s358_s29 = scalar_lea.vmem %s2271_s4, %s2109_s13  ;;  %s2117_s16 = scalar_lea.vmem [#allocation10], %s1049_s12  ;;  %v1470_v0 = vld [vmem:[#allocation6] sm:$0xff] (!%p363_p2)   ;;  %v1471_v1 = vld [vmem:[#allocation6 + $0x8] sm:$0xff] (!%p363_p2)   ;;  %v1472_v2 = vld [vmem:[#allocation6 + $0x10] sm:$0xff] (!%p363_p2)  }
  0xb1   : > { %366 = sbr.rel (%p363_p2) target bundleno = 184 (0xb8), region = 60  ;;  %431 = vst [vmem:[#allocation2] sm:$0xff] (!%p363_p2), %v1470_v0  ;;  %432 = vst [vmem:[#allocation2 + $0x8] sm:$0xff] (!%p363_p2), %v1471_v1  ;;  %v1473_v3 = vld [vmem:[#allocation6 + $0x18] sm:$0xff] (!%p363_p2)   ;;  %v1474_v4 = vld [vmem:[#allocation6 + $0x20] sm:$0xff] (!%p363_p2)  }
  0xb2   : > { %433 = vst [vmem:[#allocation2 + $0x10] sm:$0xff] (!%p363_p2), %v1472_v2  ;;  %434 = vst [vmem:[#allocation2 + $0x18] sm:$0xff] (!%p363_p2), %v1473_v3  ;;  %v1475_v5 = vld [vmem:[#allocation6 + $0x28] sm:$0xff] (!%p363_p2)   ;;  %v1476_v6 = vld [vmem:[#allocation6 + $0x30] sm:$0xff] (!%p363_p2)  }
  0xb3   : > { %435 = vst [vmem:[#allocation2 + $0x20] sm:$0xff] (!%p363_p2), %v1474_v4  ;;  %436 = vst [vmem:[#allocation2 + $0x28] sm:$0xff] (!%p363_p2), %v1475_v5  ;;  %v1477_v7 = vld [vmem:[#allocation6 + $0x38] sm:$0xff] (!%p363_p2)  }
  0xb4   : > { %437 = vst [vmem:[#allocation2 + $0x30] sm:$0xff] (!%p363_p2), %v1476_v6  ;;  %438 = vst [vmem:[#allocation2 + $0x38] sm:$0xff] (!%p363_p2), %v1477_v7 }
  0xb8 PF: > { %p439_p5 = scmp.lt.s32.totalorder %s1718_s25, 0  ;;  %s440_s3 = ssub.s32 0, %s1718_s25  ;;  %v1478_v8 = vld [vmem:[%s2087_s17] sm:$0xff]   ;;  %v598_v10 = vld [vmem:[%s2115_s26 + $0x8] sm:$0xff]  ;;  %v599_v12 = vld [vmem:[%s2115_s26 + $0x10] sm:$0xff] }
  0xb9   : > { %s1058_s23 = smin.u32 %s1718_s25, %s440_s3  ;;  %1157 = vmatprep.mubr.bf16.mxu0 %v1478_v8  ;;  %v597_v9 = vld [vmem:[%s2115_s26] sm:$0xff]  ;;  %v600_v13 = vld [vmem:[%s2115_s26 + $0x18] sm:$0xff]  ;;  %v602_v16 = vld [vmem:[%s2115_s26 + $0x28] sm:$0xff]  ;;  %s1063_s25 = sshll.u32 %s1714_s24, 6 }
  0xba   : > { %s442_s8 = sand.u32 1, %s1058_s23   ;;  %v1253_v11 = vpack.c.bf16 %v598_v10, %v597_v9  ;;  %v1257_v14 = vpack.c.bf16 %v600_v13, %v599_v12  ;;  %v601_v15 = vld [vmem:[%s2115_s26 + $0x20] sm:$0xff]  ;;  %v603_v18 = vld [vmem:[%s2115_s26 + $0x30] sm:$0xff]  ;;  %v604_v19 = vld [vmem:[%s2115_s26 + $0x38] sm:$0xff]  ;;  %p2331_p1 = scmp.ne.s32.totalorder %s2314_s9, 0 }
  0xbb   : > { %s443_s14 = ssub.s32 0, %s442_s8  ;;  %v1261_v17 = vpack.c.bf16 %v602_v16, %v601_v15  ;;  %v1265_v20 = vpack.c.bf16 %v604_v19, %v603_v18  ;;  %v605_v21 = vld [vmem:[%s2115_s26 + $0x40] sm:$0xff]  ;;  %v606_v24 = vld [vmem:[%s2115_s26 + $0x48] sm:$0xff]  ;;  %v607_v29 = vld [vmem:[%s2115_s26 + $0x50] sm:$0xff] }
  0xbc   : > { %s2351_s14 = smov (!%p439_p5, %s443_s14), %s442_s8  ;;  %1254 = vmatprep.subr.bf16.mxu1 %v1253_v11  ;;  %v1269_v26 = vpack.c.bf16 %v606_v24, %v605_v21  ;;  %v608_v30 = vld [vmem:[%s2115_s26 + $0x58] sm:$0xff]  ;;  %v609_v33 = vld [vmem:[%s2115_s26 + $0x60] sm:$0xff]  ;;  %v610_v34 = vld [vmem:[%s2115_s26 + $0x68] sm:$0xff] }
  0xbd   : > { %p1060_p6 = scmp.lt.s32.totalorder %s2351_s14, 0  ;;  %s449_s27 = sadd.s32 2, %s2351_s14  ;;  %1256 = vmatpush3.bf16.msra.mxu1 %v1253_v11  ;;  %v1273_v31 = vpack.c.bf16 %v608_v30, %v607_v29  ;;  %v1277_v35 = vpack.c.bf16 %v610_v34, %v609_v33  ;;  %v611_v37 = vld [vmem:[%s2115_s26 + $0x70] sm:$0xff]  ;;  %v612_v38 = vld [vmem:[%s2115_s26 + $0x78] sm:$0xff]  ;;  %v573_v41 = vld [vmem:[%s2098_s2] sm:$0xff] }
  0xbe   : > { %1258 = vmatprep.subr.bf16.mxu1 %v1257_v14  ;;  %v1281_v39 = vpack.c.bf16 %v612_v38, %v611_v37  ;;  %v574_v42 = vld [vmem:[%s2098_s2 + $0x8] sm:$0xff]  ;;  %v575_v47 = vld [vmem:[%s2098_s2 + $0x10] sm:$0xff]  ;;  %v576_v48 = vld [vmem:[%s2098_s2 + $0x18] sm:$0xff] }
  0xbf   : > { %s2353_s27 = smov (!%p1060_p6, %s449_s27), %s2351_s14  ;;  %v1285_v44 = vpack.c.bf16 %v574_v42, %v573_v41  ;;  %v1289_v51 = vpack.c.bf16 %v576_v48, %v575_v47  ;;  %v577_v53 = vld [vmem:[%s2098_s2 + $0x20] sm:$0xff]  ;;  %v578_v54 = vld [vmem:[%s2098_s2 + $0x28] sm:$0xff]  ;;  %v1480_v57 = vld [vmem:[%s2087_s17 + $0x10] sm:$0xff]  }
  0xc0   : > { %s1061_s5 = sshll.u32 %s2353_s27, 7  ;;  %s452_s11 = ssub.s32 1, %s2353_s27  ;;  %v1479_v55 = vld [vmem:[%s2087_s17 + $0x8] sm:$0xff]   ;;  %v1293_v56 = vpack.c.bf16 %v578_v54, %v577_v53  ;;  %v579_v58 = vld [vmem:[%s2098_s2 + $0x30] sm:$0xff]  ;;  %v580_v59 = vld [vmem:[%s2098_s2 + $0x38] sm:$0xff] }
  0xc1   : > { %s463_s6 = sshra.s32 %s1061_s5, 4  ;;  %s1062_s15 = sshll.u32 %s452_s11, 7  ;;  %1260 = vmatpush3.bf16.msra.mxu1 %v1257_v14  ;;  %v1297_v60 = vpack.c.bf16 %v580_v59, %v579_v58  ;;  %v581_v61 = vld [vmem:[%s2098_s2 + $0x40] sm:$0xff]  ;;  %v582_v62 = vld [vmem:[%s2098_s2 + $0x48] sm:$0xff]  ;;  %v1481_v63 = vld [vmem:[%s2087_s17 + $0x18] sm:$0xff]  }
  0xc2   : > { %s1064_s12 = sshll.u32 %s463_s6, 3  ;;  %s475_s30 = sadd.s32 %s1063_s25, %s1061_s5  ;;  %1262 = vmatprep.subr.bf16.mxu1 %v1261_v17  ;;  %v1301_v0 = vpack.c.bf16 %v582_v62, %v581_v61  ;;  %v583_v1 = vld [vmem:[%s2098_s2 + $0x50] sm:$0xff]  ;;  %v584_v2 = vld [vmem:[%s2098_s2 + $0x58] sm:$0xff]  ;;  %v585_v4 = vld [vmem:[%s2098_s2 + $0x60] sm:$0xff] }
  0xc3   : > { %s476_s10 = sshra.s32 %s475_s30, 4  ;;  %s2133_s3 = scalar_lea.vmem [#allocation2], %s1064_s12  ;;  %v1305_v3 = vpack.c.bf16 %v584_v2, %v583_v1  ;;  %v586_v5 = vld [vmem:[%s2098_s2 + $0x68] sm:$0xff]  ;;  %v587_v7 = vld [vmem:[%s2098_s2 + $0x70] sm:$0xff]  ;;  %v588_v8 = vld [vmem:[%s2098_s2 + $0x78] sm:$0xff] }
  0xc4   : > { %v467_v22 = vld [vmem:[%s2133_s3] sm:$0xff]  ;;  %v468_v23 = vld [vmem:[%s2133_s3 + $0x8] sm:$0xff]  ;;  %s1065_s23 = sshll.u32 %s476_s10, 3  ;;  %s2138_s8 = sadd.s32 %s1063_s25, %s1062_s15  ;;  %v469_v28 = vld [vmem:[%s2133_s3 + $0x10] sm:$0xff]  ;;  %v1309_v6 = vpack.c.bf16 %v586_v5, %v585_v4  ;;  %v1313_v9 = vpack.c.bf16 %v588_v8, %v587_v7 }
  0xc5   : > { %1141 = vmatprep.subr.bf16.mxu0 %v467_v22  ;;  %1264 = vmatpush3.bf16.msra.mxu1 %v1261_v17  ;;  %s2140_s14 = scalar_lea.vmem [#allocation2], %s1065_s23  ;;  %v470_v32 = vld [vmem:[%s2133_s3 + $0x18] sm:$0xff]  ;;  %v471_v36 = vld [vmem:[%s2133_s3 + $0x20] sm:$0xff]  ;;  %v472_v40 = vld [vmem:[%s2133_s3 + $0x28] sm:$0xff]  ;;  %s851_s26 = sshra.s32 %s2138_s8, 4 }
  0xc6   : > { %1142 = vmatpush3.bf16.msra.mxu0 %v467_v22  ;;  %v480_v25 = vld [vmem:[%s2140_s14] sm:$0xff]  ;;  %1266 = vmatprep.subr.bf16.mxu1 %v1265_v20  ;;  %v473_v43 = vld [vmem:[%s2133_s3 + $0x30] sm:$0xff]  ;;  %v481_v46 = vld [vmem:[%s2140_s14 + $0x8] sm:$0xff]  ;;  %s1071_s27 = sshll.u32 %s851_s26, 3  ;;  %s881_s25 = sshll.u32 %s2117_s16, 4  ;;  %s2200_s25 = int_to_ptr.vmem [resolvable:$true] %s881_s25 }
  0xc7   : > { %1143 = vmatprep.subr.bf16.mxu0 %v468_v23  ;;  %v589_v27 = vunpack.c.l.bf16 %v480_v25  ;;  %v590_v45 = vunpack.c.h.bf16 %v480_v25  ;;  %v474_v49 = vld [vmem:[%s2133_s3 + $0x38] sm:$0xff]  ;;  %v591_v50 = vunpack.c.l.bf16 %v481_v46  ;;  %v592_v52 = vunpack.c.h.bf16 %v481_v46  ;;  %v482_v10 = vld [vmem:[%s2140_s14 + $0x10] sm:$0xff]  ;;  %v1070_v29 = vld [vmem:[%s358_s29] ss:$0 sm:$0xff]  ;;  %s2185_s13 = scalar_lea.vmem [#allocation2], %s1071_s27  ;;  %s1080_s29 = sshll.u32 %s1714_s24, 10 }
  0xc8   : > { %v593_v11 = vunpack.c.l.bf16 %v482_v10  ;;  %v594_v12 = vunpack.c.h.bf16 %v482_v10  ;;  %v483_v13 = vld [vmem:[%s2140_s14 + $0x18] sm:$0xff]  ;;  %s2330_s6 = sld [smem:[#allocation24_spill]]  ;;  %s868_s24 = scalar_lea.sflag [#allocation5], %s2084_s0 }
  0xc9   : > { %1197 = vmatprep.mubr.f32.mxu1 %v589_v27  ;;  %1268 = vmatpush3.bf16.msra.mxu1 %v1265_v20  ;;  %v595_v14 = vunpack.c.l.bf16 %v483_v13  ;;  %v596_v15 = vunpack.c.h.bf16 %v483_v13  ;;  %s1600_s12 = scalar_lea.vmem %s2200_s25, 1024  ;;  %s1740_s30 = smov [#allocation10]  }
  0xca   : > { %1144 = vmatpush3.bf16.msra.mxu0 %v468_v23  ;;  %1270 = vmatprep.subr.bf16.mxu1 %v1269_v26  ;;  %p1601_p12 = scmp.ne.s32.totalorder %s2200_s25, %s1600_s12  ;;  %s1604_s10 = sshll.u32 %s1740_s30, 4  ;;  %s1605_s10 = int_to_ptr.vmem [resolvable:$false] %s1604_s10 }
  0xcb   : > { %1145 = vmatprep.subr.bf16.mxu0 %v469_v28  ;;  %s1606_s3 = scalar_lea.vmem %s1605_s10, 2048  ;;  %p1607_p8 = scmp.lt.s32.totalorder %s2200_s25, %s1605_s10 }
  0xcc   : > { %p1602_p13 = pnand %p1601_p12, %p2331_p1  ;;  %p1608_p9 = scmp.lt.s32.totalorder %s1606_s3, %s1600_s12 }
  0xcd   : > { %1272 = vmatpush3.bf16.msra.mxu1 %v1269_v26 }
  0xce   : > { %1146 = vmatpush3.bf16.msra.mxu0 %v469_v28  ;;  %1274 = vmatprep.subr.bf16.mxu1 %v1273_v31  ;;  %s2198_s15 = scalar_lea.hbm %s2330_s6, %s1080_s29  ;;  %p1603_p4 = pneg %p1602_p13 }
  0xcf   : > { %1147 = vmatprep.subr.bf16.mxu0 %v470_v32  ;;  %p1609_p0 = por %p1608_p9, %p1607_p8 }
  0xd1   : > { %1276 = vmatpush3.bf16.msra.mxu1 %v1273_v31  ;;  %p1610_p3 = pnand %p1609_p0, %p1603_p4 }
  0xd2   : > { %1148 = vmatpush3.bf16.msra.mxu0 %v470_v32  ;;  %1278 = vmatprep.subr.bf16.mxu1 %v1277_v35 }
  0xd3   : > { %1149 = vmatprep.subr.bf16.mxu0 %v471_v36 }
  0xd5   : > { %1280 = vmatpush3.bf16.msra.mxu1 %v1277_v35 }
  0xd6   : > { %1150 = vmatpush3.bf16.msra.mxu0 %v471_v36  ;;  %1282 = vmatprep.subr.bf16.mxu1 %v1281_v39 }
  0xd7   : > { %1151 = vmatprep.subr.bf16.mxu0 %v472_v40 }
  0xd9   : > { %1284 = vmatpush3.bf16.msra.mxu1 %v1281_v39 }
  0xda   : > { %1152 = vmatpush3.bf16.msra.mxu0 %v472_v40  ;;  %1317 = vmatprep.subr.bf16.mxu1 %v1285_v44 }
  0xdb   : > { %1153 = vmatprep.subr.bf16.mxu0 %v473_v43 }
  0xdc   : > { %1198 = vmatmul.mubr.f32.vlgmr.msra.gmra.mrb[0].mxu1 %v590_v45 }
  0xdd   : > { %1325 = vmatpush3.bf16.msra.mxu1 %v1285_v44  ;;  %1200 = vmatprep.mubr.f32.mxu1 %v591_v50 }
  0xde   : > { %1154 = vmatpush3.bf16.msra.mxu0 %v473_v43  ;;  %1318 = vmatprep.subr.bf16.mxu1 %v1289_v51 }
  0xdf   : > { %1155 = vmatprep.subr.bf16.mxu0 %v474_v49 }
  0xe0   : > { %1201 = vmatmul.mubr.f32.gmra.mrb[2].mxu1 %v592_v52 }
  0xe1   : > { %1326 = vmatpush3.bf16.msra.mxu1 %v1289_v51  ;;  %1203 = vmatprep.mubr.f32.mxu1 %v593_v11 }
  0xe2   : > { %1156 = vmatpush3.bf16.msra.mxu0 %v474_v49  ;;  %1319 = vmatprep.subr.bf16.mxu1 %v1293_v56 }
  0xe3   : > { %1286 = vmatprep.subr.bf16.mxu0 %v1285_v44 }
  0xe4   : > { %1204 = vmatmul.mubr.f32.gmra.mrb[4].mxu1 %v594_v12 }
  0xe5   : > { %1158 = vmatmul.mubr.bf16.vlgmr.msra.gmra.mrb[0].mxu0 %v1479_v55  ;;  %1327 = vmatpush3.bf16.msra.mxu1 %v1293_v56 }
  0xe6   : > { %1161 = vmatprep.mubr.bf16.mxu0 %v1480_v57  ;;  %1288 = vmatpush3.bf16.msra.mxu0 %v1285_v44 }
  0xe7   : > { %1290 = vmatprep.subr.bf16.mxu0 %v1289_v51  ;;  %1320 = vmatprep.subr.bf16.mxu1 %v1297_v60 }
  0xe8   : > { %1206 = vmatprep.mubr.f32.mxu1 %v595_v14 }
  0xe9   : > { %1328 = vmatpush3.bf16.msra.mxu1 %v1297_v60 }
  0xea   : > { %1292 = vmatpush3.bf16.msra.mxu0 %v1289_v51  ;;  %1321 = vmatprep.subr.bf16.mxu1 %v1301_v0 }
  0xeb   : > { %1294 = vmatprep.subr.bf16.mxu0 %v1293_v56  ;;  %1207 = vmatmul.mubr.f32.gmra.mrb[6].mxu1 %v596_v15 }
  0xed   : > { %1162 = vmatmul.mubr.bf16.gmra.mrb[4].mxu0 %v1481_v63  ;;  %1329 = vmatpush3.bf16.msra.mxu1 %v1301_v0 }
  0xee   : > { %1296 = vmatpush3.bf16.msra.mxu0 %v1293_v56  ;;  %1322 = vmatprep.subr.bf16.mxu1 %v1305_v3 }
  0xef   : > { %1298 = vmatprep.subr.bf16.mxu0 %v1297_v60 }
  0xf1   : > { %1330 = vmatpush3.bf16.msra.mxu1 %v1305_v3 }
  0xf2   : > { %1300 = vmatpush3.bf16.msra.mxu0 %v1297_v60  ;;  %1323 = vmatprep.subr.bf16.mxu1 %v1309_v6 }
  0xf3   : > { %1302 = vmatprep.subr.bf16.mxu0 %v1301_v0 }
  0xf5   : > { %1331 = vmatpush3.bf16.msra.mxu1 %v1309_v6 }
  0xf6   : > { %1304 = vmatpush3.bf16.msra.mxu0 %v1301_v0  ;;  %1324 = vmatprep.subr.bf16.mxu1 %v1313_v9 }
  0xf7   : > { %1306 = vmatprep.subr.bf16.mxu0 %v1305_v3 }
  0xf9   : > { %1332 = vmatpush3.bf16.msra.mxu1 %v1313_v9 }
  0xfa   : > { %1308 = vmatpush3.bf16.msra.mxu0 %v1305_v3 }
  0xfb   : > { %1310 = vmatprep.subr.bf16.mxu0 %v1309_v6 }
  0xfe   : > { %1312 = vmatpush3.bf16.msra.mxu0 %v1309_v6 }
  0xff   : > { %1314 = vmatprep.subr.bf16.mxu0 %v1313_v9 }
 0x102   : > { %1316 = vmatpush3.bf16.msra.mxu0 %v1313_v9 }
 0x1af   : > { %v1199_v16 = vpop.f32.mrb[0].mxu1 }
 0x1b0   : > { %v679_v17 = vpop.f32.mrb[1].mxu1 }
 0x1b3   : > { %v1202_v18 = vpop.f32.mrb[2].mxu1 }
 0x1b4   : > { %v689_v19 = vpop.f32.mrb[3].mxu1 }
 0x1b8   : > { %v1159_v20 = vpop.f32.mrb[0].mxu0 }
 0x1b9   : > { %v542_v21 = vpop.f32.mrb[1].mxu0 }
 0x1ba   : > { %v1160_v22 = vpop.f32.mrb[2].mxu0  ;;  %1241 = vmatprep.mubr.f32.mxu0 %v542_v21 }
 0x1bb   : > { %v545_v23 = vpop.f32.mrb[3].mxu0 }
 0x1bc   : > { %1242 = vmatmul.mubr.f32.vlgmr.msra.gmra.mrb[8].mxu0 %v545_v23 }
 0x1bd   : > { %1244 = vmatprep.mubr.f32.mxu0 %v1159_v20 }
 0x1c0   : > { %v1163_v24 = vpop.f32.mrb[4].mxu0  ;;  %1245 = vmatmul.mubr.f32.gmra.mrb[10].mxu0 %v1160_v22 }
 0x1c1   : > { %v558_v25 = vpop.f32.mrb[5].mxu0 }
 0x1c2   : > { %v1164_v26 = vpop.f32.mrb[6].mxu0  ;;  %1247 = vmatprep.mubr.f32.mxu1 %v558_v25 }
 0x1c3   : > { %v561_v27 = vpop.f32.mrb[7].mxu0 }
 0x1c4   : > { %1248 = vmatmul.mubr.f32.vlgmr.msra.gmra.mrb[4].mxu1 %v561_v27 }
 0x1c5   : > { %1250 = vmatprep.mubr.f32.mxu1 %v1163_v24 }
 0x1c8   : > { %1251 = vmatmul.mubr.f32.gmra.mrb[6].mxu1 %v1164_v26 }
 0x28f   : > { %v1243_v28 = vpop.f32.mrb[8].mxu0 }
 0x290   : > { %v790_v30 = vadd.f32 %v1243_v28, %v1199_v16  ;;  %v784_v31 = vpop.f32.mrb[9].mxu0 }
 0x291   : > { %v785_v32 = vadd.f32 %v784_v31, %v679_v17 }
 0x292   : > { %v831_v33 = vadd.f32 %v1070_v29, %v790_v30 }
 0x293   : > { %v830_v34 = vadd.f32 %v1070_v29, %v785_v32  ;;  %v1246_v35 = vpop.f32.mrb[10].mxu0 }
 0x294   : > { %v839_v36 = vmax.f32 %v831_v33, 0.0  ;;  %v800_v37 = vadd.f32 %v1246_v35, %v1202_v18  ;;  %v794_v38 = vpop.f32.mrb[11].mxu0 }
 0x295   : > { %v838_v39 = vmax.f32 %v830_v34, 0.0  ;;  %v795_v40 = vadd.f32 %v794_v38, %v689_v19 }
 0x296   : > { %860 = vst [vmem:[%s2117_s16 + $0x8] sm:$0xff] %v839_v36  ;;  %v833_v41 = vadd.f32 %v1070_v29, %v800_v37 }
 0x297   : > { %v846_v42 = vpack.c.bf16 %v839_v36, %v838_v39  ;;  %859 = vst [vmem:[%s2117_s16] sm:$0xff] %v838_v39  ;;  %v832_v43 = vadd.f32 %v1070_v29, %v795_v40  ;;  %v1249_v44 = vpop.f32.mrb[4].mxu1 }
 0x298   : > { %v841_v45 = vmax.f32 %v833_v41, 0.0  ;;  %v835_v46 = vadd.f32 %v1249_v44, %v1070_v29  ;;  %v804_v47 = vpop.f32.mrb[5].mxu1 }
 0x299   : > { %855 = vst [vmem:[%s2185_s13] sm:$0xff] %v846_v42  ;;  %v840_v48 = vmax.f32 %v832_v43, 0.0  ;;  %v834_v49 = vadd.f32 %v1070_v29, %v804_v47 }
 0x29a   : > { %862 = vst [vmem:[%s2117_s16 + $0x18] sm:$0xff] %v841_v45  ;;  %v843_v50 = vmax.f32 %v835_v46, 0.0 }
 0x29b   : > { %v847_v51 = vpack.c.bf16 %v841_v45, %v840_v48  ;;  %861 = vst [vmem:[%s2117_s16 + $0x10] sm:$0xff] %v840_v48  ;;  %v842_v52 = vmax.f32 %v834_v49, 0.0  ;;  %v1252_v53 = vpop.f32.mrb[6].mxu1 }
 0x29c   : > { %864 = vst [vmem:[%s2117_s16 + $0x28] sm:$0xff] %v843_v50  ;;  %v837_v54 = vadd.f32 %v1252_v53, %v1070_v29  ;;  %v814_v55 = vpop.f32.mrb[7].mxu1 }
 0x29d   : > { %856 = vst [vmem:[%s2185_s13 + $0x8] sm:$0xff] %v847_v51  ;;  %v848_v56 = vpack.c.bf16 %v843_v50, %v842_v52  ;;  %863 = vst [vmem:[%s2117_s16 + $0x20] sm:$0xff] %v842_v52  ;;  %v836_v57 = vadd.f32 %v1070_v29, %v814_v55 }
 0x29e   : > { %v845_v58 = vmax.f32 %v837_v54, 0.0 }
 0x29f   : > { %857 = vst [vmem:[%s2185_s13 + $0x10] sm:$0xff] %v848_v56  ;;  %v844_v59 = vmax.f32 %v836_v57, 0.0 }
 0x2a0   : > { %866 = vst [vmem:[%s2117_s16 + $0x38] sm:$0xff] %v845_v58 }
 0x2a1   : > { %v849_v60 = vpack.c.bf16 %v845_v58, %v844_v59  ;;  %865 = vst [vmem:[%s2117_s16 + $0x30] sm:$0xff] %v844_v59 }
 0x2a2   : > { %1613 = shalt.err (!%p1610_p3)
}
 0x2a3   : > { %s1614_s16 = scalar_lea.hbm %s2198_s15, 1024  ;;  %s1618_s14 = scalar_lea.hbm %s2330_s6, 2048 }
 0x2a4   : > { %p1615_p7 = scmp.ne.s32.totalorder %s2198_s15, %s1614_s16  ;;  %p1619_p2 = scmp.lt.u32.totalorder %s2198_s15, %s2330_s6 }
 0x2a5   : > { %p1620_p5 = scmp.lt.u32.totalorder %s1618_s14, %s1614_s16  ;;  %p1622_p12 = scmp.lt.u32.totalorder %s1614_s16, %s2198_s15 }
 0x2a6   : > { %p1616_p11 = pnand %p1615_p7, %p2331_p1 }
 0x2a7   : > { %p1621_p6 = por %p1620_p5, %p1619_p2 }
 0x2a8   : > { %p1617_p10 = pneg %p1616_p11 }
 0x2a9   : > { %p1623_p13 = por %p1622_p12, %p1621_p6 }
 0x2ab   : > { %p1624_p4 = pnand %p1623_p13, %p1617_p10 }
 0x2ad   : > { %1627 = shalt.err (!%p1624_p4)
}
 0x2ae   : > { %s1741_s26 = smov 128   ;;  %s1742_s27 = smov 8   ;;  %858 = vst [vmem:[%s2185_s13 + $0x18] sm:$0xff] %v849_v60 }
 0x2af   : > { %1351 = dma.vmem_to_hbm [thread:$0]  (%p2331_p1), %s2200_s25, 1024, %s2198_s15, %s868_s24, %s1741_s26, %s1741_s26, %s1742_s27  }
 0x2b0 PF: > { %p1374_p8 = scmp.ge.s32.totalorder %s1730_s28, 2  ;;  %s896_s29 = sand.u32 1, %s1702_s21  }
 0x2b1   : > { %p2332_p9 = scmp.ne.s32.totalorder %s2315_s18, 0  ;;  %s897_s5 = scalar_lea.sflag [#allocation5], %s896_s29 }
 0x2b3   : > { %p1368_p0 = pnand %p1374_p8, %p2332_p9 }
 0x2b5   : > { %1685 = dma.done.wait (!%p1368_p0), %s897_s5, 1024  }
 0x2b6   : > { %1687 = vsyncadd (!%p1368_p0), %s897_s5, 4294966272  ;;  %s22_s28 = sadd.s32 1, %s1730_s28   ;;  %s2333_s9 = sld [smem:[#allocation15_spill]] }
 0x2b7   : > { %p19_p3 = scmp.ge.s32.totalorder %s22_s28, 8   ;;  %s2334_s23 = sld [smem:[#allocation19_spill]] }
 0x2b8   : > { %s2335_s24 = sld [smem:[#allocation16_spill]]  ;;  %s2336_s25 = sld [smem:[#allocation17_spill]] }
 0x2b9   : > { %s2337_s26 = sld [smem:[#allocation18_spill]]  ;;  %s2338_s27 = sld [smem:[#allocation20_spill]] }
 0x2ba   : > { %s2339_s18 = smov %s1694_s19  ;;  %s2340_s19 = smov %s1698_s20 }
 0x2bb   : > { %s2341_s20 = smov %s1939_s7  ;;  %s2342_s21 = smov %s1706_s22 }
 0x2bc   : > { %s2343_s22 = smov %s2333_s9  ;;  %21 = sbr.rel (!%p19_p3) target bundleno = 15 (0xf), region = 121 }
 0x2c3   :  { %902 = vsyncpa [#allocation4], 1 }
 0x2c4   :  { %904 = vsyncpa [#allocation4 + $0x1], 1 }
 0x2c5   :  { %905 = vsyncpa [#allocation7], 1 }
 0x2c6   :  { %906 = vsyncpa [#allocation5], 1 }
 0x2c7   :  { %908 = vsyncpa [#allocation5 + $0x1], 1 }

</bundles_post_ra>
